<compile_context>
chip_gen: v5e
topology: v5e:2x2
jax: 0.10.0
libtpu: 0.0.40
codegen_flags: <defaults>
</compile_context>

<pallas_src>
import functools

import jax
import jax.numpy as jnp
from jax.experimental import pallas as pl
from jax.experimental.pallas import tpu as pltpu


# ----------------------------------------------------------------------------
# helpers
# ----------------------------------------------------------------------------
def _round_up(x, m):
    return (x + m - 1) // m * m


def _row_tile(m):
    """Row (sublane) tile. Prefer a tile that divides m exactly so no pad /
    slice-back HBM copies are needed around the pallas_call."""
    if m % 8 == 0:
        for tm in (256, 128, 64, 32, 16, 8):
            if m % tm == 0:
                return tm, m
    tm = min(256, _round_up(m, 8))
    return tm, _round_up(m, tm)


def _col_tile(n):
    """Channel (lane) tile: 256 for the wide stages, full N otherwise."""
    if n > 256 and n % 256 == 0:
        return 256
    return n


def _im2col(x, kh, kw, stride, pad):
    """x: (B, H, W, C) -> (B*OH*OW, kh*kw*C) patches (bf16 to halve glue bytes).

    TODO(synk): replace with an implicit-GEMM Pallas conv so the kh*kw
    duplicated patch tensor never round-trips HBM; kept as XLA glue for now.
    """
    B, H, W, C = x.shape
    xp = jnp.pad(x, ((0, 0), (pad, pad), (pad, pad), (0, 0)))
    OH = (H + 2 * pad - kh) // stride + 1
    OW = (W + 2 * pad - kw) // stride + 1
    cols = []
    for i in range(kh):
        for j in range(kw):
            cols.append(xp[:, i:i + stride * OH:stride,
                           j:j + stride * OW:stride, :])
    patches = jnp.concatenate(cols, axis=-1)            # (B, OH, OW, kh*kw*C)
    return patches.reshape(B * OH * OW, kh * kw * C), (B, OH, OW)


# ----------------------------------------------------------------------------
# Pallas kernels
# ----------------------------------------------------------------------------
def _gemm_kernel(x_ref, w_ref, b_ref, *rest, relu, fuse_res):
    # bf16 x bf16 -> f32 accumulation on the MXU; BN shift (+ optional fused
    # residual add) + optional ReLU epilogue in f32; store bf16.
    if fuse_res:
        r_ref, o_ref = rest
    else:
        (o_ref,) = rest
    y = jnp.dot(x_ref[...], w_ref[...], preferred_element_type=jnp.float32)
    y = y + b_ref[...]
    if fuse_res:
        y = y + rest[0][...].astype(jnp.float32)
    if relu:
        y = jnp.maximum(y, 0.0)
    o_ref[...] = y.astype(o_ref.dtype)


def _maxpool_kernel(r0_ref, r1_ref, r2_ref, o_ref, *, ow):
    # Each grid step handles one output row.  The three refs are the padded
    # input rows 2*oh, 2*oh+1, 2*oh+2 (shape (1, 1, Wp, C)).  Vertical max on
    # the VPU; the stride-2 horizontal subsample + 3-tap max is done with
    # exact one-hot selection matmuls (each sel row has a single 1.0), which
    # avoids strided loads and any materialized window tensor.
    wp = r0_ref.shape[2]
    vm = jnp.maximum(
        jnp.maximum(r0_ref[0, 0].astype(jnp.float32),
                    r1_ref[0, 0].astype(jnp.float32)),
        r2_ref[0, 0].astype(jnp.float32))                       # (Wp, C)
    rows = jax.lax.broadcasted_iota(jnp.int32, (ow, wp), 0)
    cols = jax.lax.broadcasted_iota(jnp.int32, (ow, wp), 1)
    m = None
    for j in range(3):
        sel = (cols == 2 * rows + j).astype(jnp.float32)        # (OW, Wp)
        tap = jnp.dot(sel, vm, preferred_element_type=jnp.float32)
        m = tap if m is None else jnp.maximum(m, tap)
    o_ref[0, 0] = m.astype(o_ref.dtype)


def _avgpool_kernel(x_ref, o_ref):
    # x_ref: (1, HW, C) -> (1, 1, C) global average pool in f32.
    o_ref[...] = jnp.mean(x_ref[...].astype(jnp.float32), axis=1, keepdims=True)


# ----------------------------------------------------------------------------
# Pallas wrappers
# ----------------------------------------------------------------------------
def pallas_gemm(x, w, bias, *, relu, residual=None, out_dtype=jnp.bfloat16):
    """x:(M,K) bf16, w:(K,N) bf16 (BN scale pre-folded), bias:(N,) f32."""
    M, K = x.shape
    N = w.shape[1]
    tm, m_pad = _row_tile(M)
    tn = _col_tile(N)
    if m_pad != M:
        x = jnp.pad(x, ((0, m_pad - M), (0, 0)))
        if residual is not None:
            residual = jnp.pad(residual, ((0, m_pad - M), (0, 0)))

    in_specs = [
        pl.BlockSpec((tm, K), lambda i, j: (i, 0)),
        pl.BlockSpec((K, tn), lambda i, j: (0, j)),
        pl.BlockSpec((1, tn), lambda i, j: (0, j)),
    ]
    args = [x, w, bias.reshape(1, N)]
    if residual is not None:
        in_specs.append(pl.BlockSpec((tm, tn), lambda i, j: (i, j)))
        args.append(residual)

    out = pl.pallas_call(
        functools.partial(_gemm_kernel, relu=relu,
                          fuse_res=residual is not None),
        out_shape=jax.ShapeDtypeStruct((m_pad, N), out_dtype),
        grid=(m_pad // tm, N // tn),
        in_specs=in_specs,
        out_specs=pl.BlockSpec((tm, tn), lambda i, j: (i, j)),
        compiler_params=pltpu.CompilerParams(
            dimension_semantics=("parallel", "parallel")),
    )(*args)
    return out[:M] if m_pad != M else out


def conv_bn(x_nhwc, w_oihw, bn, stride, pad, relu, residual_nhwc=None):
    """Conv2d(bias=False) + eval-mode BatchNorm2d [+ residual add] [+ ReLU]."""
    cout, cin, kh, kw = w_oihw.shape
    cols, (B, OH, OW) = _im2col(x_nhwc.astype(jnp.bfloat16), kh, kw, stride, pad)
    gamma, beta, mean, var = bn
    scale = gamma / jnp.sqrt(var + 1e-5)
    shift = (beta - mean * scale).astype(jnp.float32)
    # weight (Cout,Cin,KH,KW) -> (KH*KW*Cin, Cout); fold BN scale into columns.
    w_mat = jnp.transpose(w_oihw, (2, 3, 1, 0)).reshape(kh * kw * cin, cout)
    w_mat = (w_mat * scale[None, :]).astype(jnp.bfloat16)
    res = None
    if residual_nhwc is not None:
        res = residual_nhwc.astype(jnp.bfloat16).reshape(B * OH * OW, cout)
    y = pallas_gemm(cols, w_mat, shift, relu=relu, residual=res)
    return y.reshape(B, OH, OW, cout)


def maxpool_3x3_s2_p1(x_nhwc):
    B, H, W, C = x_nhwc.shape
    OH = (H + 2 - 3) // 2 + 1
    OW = (W + 2 - 3) // 2 + 1
    # Large negative finite pad (not -inf) so the in-kernel selection matmul
    # never produces inf*0 NaNs; every 3x3 window contains a real element.
    xp = jnp.pad(x_nhwc, ((0, 0), (1, 1), (1, 1), (0, 0)),
                 constant_values=-1e30)
    Hp, Wp = H + 2, W + 2

    def row_spec(di):
        return pl.BlockSpec((1, 1, Wp, C),
                            lambda b, oh, di=di: (b, 2 * oh + di, 0, 0))

    return pl.pallas_call(
        functools.partial(_maxpool_kernel, ow=OW),
        out_shape=jax.ShapeDtypeStruct((B, OH, OW, C), x_nhwc.dtype),
        grid=(B, OH),
        in_specs=[row_spec(0), row_spec(1), row_spec(2)],
        out_specs=pl.BlockSpec((1, 1, OW, C), lambda b, oh: (b, oh, 0, 0)),
        compiler_params=pltpu.CompilerParams(
            dimension_semantics=("parallel", "parallel")),
    )(xp, xp, xp)


def global_avgpool(x_nhwc):
    B, H, W, C = x_nhwc.shape
    x2 = x_nhwc.reshape(B, H * W, C)
    out = pl.pallas_call(
        _avgpool_kernel,
        out_shape=jax.ShapeDtypeStruct((B, 1, C), jnp.float32),
        grid=(B,),
        in_specs=[pl.BlockSpec((1, H * W, C), lambda b: (b, 0, 0))],
        out_specs=pl.BlockSpec((1, 1, C), lambda b: (b, 0, 0)),
        compiler_params=pltpu.CompilerParams(
            dimension_semantics=("parallel",)),
    )(x2)
    return out.reshape(B, C)


# ----------------------------------------------------------------------------
# ModifiedResNet forward
# ----------------------------------------------------------------------------
def modified_resnet_forward(x_nchw, params):
    # Accepts PyTorch NCHW input, converts once to channels-last bf16, returns
    # (B, features) exactly like x.view(x.size(0), -1) in the reference (the
    # base model ends with AdaptiveAvgPool2d((1,1)) so spatial collapses).
    x = jnp.transpose(x_nchw, (0, 2, 3, 1)).astype(jnp.bfloat16)

    # replacement first conv (7x7, stride 2, pad 3, no bias) + bn1 + relu
    x = conv_bn(x, params["conv1_w"], params["bn1"], stride=2, pad=3, relu=True)
    # maxpool 3x3 stride 2 pad 1
    x = maxpool_3x3_s2_p1(x)

    # layer1 .. layer4 (BasicBlocks); residual add+ReLU fused into conv2's GEMM.
    for stage in params["stages"]:
        for blk in stage:
            if "down_w" in blk:
                identity = conv_bn(x, blk["down_w"], blk["down_bn"],
                                   stride=blk["stride"], pad=0, relu=False)
            else:
                identity = x
            h = conv_bn(x, blk["conv1_w"], blk["bn1"],
                        stride=blk["stride"], pad=1, relu=True)
            x = conv_bn(h, blk["conv2_w"], blk["bn2"],
                        stride=1, pad=1, relu=True, residual_nhwc=identity)

    # AdaptiveAvgPool2d((1,1)) + view(B, -1)
    return global_avgpool(x)


# ----------------------------------------------------------------------------
# deterministic synthetic parameters
# ----------------------------------------------------------------------------
BLOCKS = (1, 1, 1, 1)          # blocks per stage of the synthetic base model
STAGE_CHANNELS = (64, 128, 256, 512)


def init_params(input_channels, key):
    keys = iter(jax.random.split(key, 256))

    def conv_w(cout, cin, k):
        fan_in = cin * k * k
        return (jax.random.normal(next(keys), (cout, cin, k, k), jnp.float32)
                * (2.0 / fan_in) ** 0.5)

    def bn(c):
        # (gamma, beta, running_mean, running_var) — eval-mode BatchNorm
        return (jnp.ones((c,), jnp.float32), jnp.zeros((c,), jnp.float32),
                jnp.zeros((c,), jnp.float32), jnp.ones((c,), jnp.float32))

    params = {"conv1_w": conv_w(64, input_channels, 7), "bn1": bn(64)}
    stages = []
    in_c = 64
    for si, (c, nb) in enumerate(zip(STAGE_CHANNELS, BLOCKS)):
        stage = []
        for bi in range(nb):
            stride = 1 if (si == 0 or bi > 0) else 2
            blk = {"stride": stride,
                   "conv1_w": conv_w(c, in_c, 3), "bn1": bn(c),
                   "conv2_w": conv_w(c, c, 3), "bn2": bn(c)}
            if stride != 1 or in_c != c:
                blk["down_w"] = conv_w(c, in_c, 1)
                blk["down_bn"] = bn(c)
            stage.append(blk)
            in_c = c
        stages.append(stage)
    params["stages"] = stages
    return params


# ----------------------------------------------------------------------------
if __name__ == "__main__":
    B, C_in, H, W = 2, 4, 16, 16
    x = jax.random.normal(jax.random.PRNGKey(0), (B, C_in, H, W), jnp.float32)
    params = init_params(C_in, jax.random.PRNGKey(1))

    out = modified_resnet_forward(x, params)
    out = jax.block_until_ready(out)

    assert out.shape == (B, STAGE_CHANNELS[-1]), out.shape
    assert bool(jnp.all(jnp.isfinite(out)))
    # TODO(synk): BatchNorm is evaluated with running statistics (eval mode);
    # training-mode batch statistics are not reproduced.
    print("KERNEL_OK")
</pallas_src>

<mosaic_0001>
module attributes {stable_mosaic.version = 11 : i64} {
  func.func @_gemm_kernel(%arg0: i32, %arg1: i32, %arg2: memref<128x196xbf16, #tpu.memory_space<vmem>>, %arg3: memref<196x64xbf16, #tpu.memory_space<vmem>>, %arg4: memref<1x64xf32, #tpu.memory_space<vmem>>, %arg5: memref<128x64xbf16, #tpu.memory_space<vmem>>) attributes {dimension_semantics = [#tpu.dimension_semantics<parallel>, #tpu.dimension_semantics<parallel>], iteration_bounds = array<i64: 1, 1>, scalar_prefetch = 0 : i64, scratch_operands = 0 : i64, tpu.core_type = #tpu.core_type<tc>, window_params = [{transform_indices = @transform_0, window_bounds = array<i64: 128, 196>}, {transform_indices = @transform_1, window_bounds = array<i64: 196, 64>}, {transform_indices = @transform_2, window_bounds = array<i64: 1, 64>}, {transform_indices = @transform_3, window_bounds = array<i64: 128, 64>}]} {
    %c0 = arith.constant 0 : index
    %c0_0 = arith.constant 0 : index
    %0 = vector.load %arg2[%c0, %c0_0] : memref<128x196xbf16, #tpu.memory_space<vmem>>, vector<128x196xbf16>
    %c0_1 = arith.constant 0 : index
    %c0_2 = arith.constant 0 : index
    %1 = vector.load %arg3[%c0_1, %c0_2] : memref<196x64xbf16, #tpu.memory_space<vmem>>, vector<196x64xbf16>
    %cst = arith.constant dense<0.000000e+00> : vector<128x64xf32>
    %2 = tpu.matmul %0, %1, %cst {dimension_numbers = #tpu.dot_dimension_numbers<[1], [0], [0], [1], [0, 0, 1, 1], [], []>} : vector<128x196xbf16>, vector<196x64xbf16>, vector<128x64xf32> -> vector<128x64xf32>
    %c0_3 = arith.constant 0 : index
    %c0_4 = arith.constant 0 : index
    %3 = vector.load %arg4[%c0_3, %c0_4] : memref<1x64xf32, #tpu.memory_space<vmem>>, vector<1x64xf32>
    %4 = vector.broadcast %3 : vector<1x64xf32> to vector<128x64xf32>
    %5 = arith.addf %2, %4 : vector<128x64xf32>
    %cst_5 = arith.constant 0.000000e+00 : f32
    %6 = vector.broadcast %cst_5 : f32 to vector<128x64xf32>
    %7 = arith.maximumf %5, %6 : vector<128x64xf32>
    %8 = arith.truncf %7 : vector<128x64xf32> to vector<128x64xbf16>
    %c0_6 = arith.constant 0 : index
    %c0_7 = arith.constant 0 : index
    %9 = vector.load %arg5[%c0_6, %c0_7] : memref<128x64xbf16, #tpu.memory_space<vmem>>, vector<128x64xbf16>
    tpu.vector_store %arg5[%c0_6, %c0_7], %8 {strides = array<i32>} : memref<128x64xbf16, #tpu.memory_space<vmem>>, vector<128x64xbf16>,
    return
  }
  func.func @transform_0(%arg0: i32, %arg1: i32) -> (i32, i32) {
    %c0_i32 = arith.constant 0 : i32
    %c0_i32_0 = arith.constant 0 : i32
    return %arg0, %c0_i32 : i32, i32
  }
  func.func @transform_1(%arg0: i32, %arg1: i32) -> (i32, i32) {
    %c0_i32 = arith.constant 0 : i32
    %c0_i32_0 = arith.constant 0 : i32
    return %c0_i32, %arg1 : i32, i32
  }
  func.func @transform_2(%arg0: i32, %arg1: i32) -> (i32, i32) {
    %c0_i32 = arith.constant 0 : i32
    %c0_i32_0 = arith.constant 0 : i32
    return %c0_i32, %arg1 : i32, i32
  }
  func.func @transform_3(%arg0: i32, %arg1: i32) -> (i32, i32) {
    %c0_i32 = arith.constant 0 : i32
    return %arg0, %arg1 : i32, i32
  }
}

</mosaic_0001>

<bundles_post_ra>
// kernel: tpu_custom_call.1
= control target key start
LH: loop header
LB: loop body
LE: loop exit
PB: predicated region body
PF: predicated region fallthrough
CT: control target
= control target key end

     0   :  { %vm232_vm0 = vcmask 1041408   ;;  %vm207_vm1 = vcmask 556032   ;;  %vm366_vm2 = vcmask 519168   ;;  %s803_s1 = inlined_call_operand.vmem [shape: bf16[196,64], index: 1, kind: input, shape index: {}]   ;;  %s804_s0 = inlined_call_operand.vmem [shape: bf16[128,196], index: 0, kind: input, shape index: {}]   ;;  %s805_s2 = inlined_call_operand.vmem [shape: f32[1,64], index: 2, kind: input, shape index: {}]   ;;  %s806_s3 = inlined_call_operand.vmem [shape: bf16[128,64], index: 3, kind: output, shape index: {}]  }
   0x1   :  { %v530_v0 = vld [vmem:[%s803_s1 + $0x38] sm:$0xff]  ;;  %v55_v1 = vld [vmem:[%s803_s1 + $0x60] sm:$0x3]  ;;  %v529_v3 = vld [vmem:[%s803_s1 + $0x30] sm:$0xff] }
   0x2   :  { %v181_v2 = vunpack.c.l.b16 %v55_v1  ;;  %236 = vmatpush.bf16.msra.mxu0 %v530_v0  ;;  %535 = vmatpush.bf16.msra.mxu2 %v530_v0  ;;  %v534_v6 = vld [vmem:[%s803_s1 + $0x58] sm:$0xff]  ;;  %v528_v7 = vld [vmem:[%s803_s1 + $0x28] sm:$0xff]  ;;  %v533_v8 = vld [vmem:[%s803_s1 + $0x50] sm:$0xff] }
   0x3   :  { %v527_v9 = vld [vmem:[%s803_s1 + $0x20] sm:$0xff]  ;;  %v532_v10 = vld [vmem:[%s803_s1 + $0x48] sm:$0xff]  ;;  %v526_v11 = vld [vmem:[%s803_s1 + $0x18] sm:$0xff] }
   0x4   :  { %v194_v4 = vpack.c.b16 %v181_v2, %v181_v2  ;;  %v531_v12 = vld [vmem:[%s803_s1 + $0x40] sm:$0xff]  ;;  %v525_v13 = vld [vmem:[%s803_s1 + $0x10] sm:$0xff]  ;;  %v391_v15 = vld [vmem:[%s804_s0 + $0x8] sm:$0xf0] }
   0x5   :  { %v507_v14 = vld [vmem:[%s804_s0 + $0x4] sm:$0xf]  ;;  %v517_v16 = vld [vmem:[%s804_s0 + $0x54] sm:$0xf]  ;;  %v431_v17 = vld [vmem:[%s804_s0 + $0x58] sm:$0xf0] }
   0x6   :  { %v234_v5 = vsel %vm232_vm0, %v194_v4, 0  ;;  %237 = vmatpush.bf16.msra.mxu0 %v529_v3  ;;  %536 = vmatpush.bf16.msra.mxu2 %v529_v3  ;;  %v394_v18 = vor.u32 %v507_v14, %v391_v15  ;;  %v524_v19 = vld [vmem:[%s803_s1 + $0x8] sm:$0xff]  ;;  %v434_v20 = vor.u32 %v517_v16, %v431_v17  ;;  %v523_v21 = vld [vmem:[%s803_s1] sm:$0xff]  ;;  %v509_v28 = vld [vmem:[%s804_s0 + $0x14] sm:$0xf] }
   0x7   :  { %288 = vmatpush.bf16.msra.mxu1 %v234_v5  ;;  %543 = vmatpush.bf16.msra.mxu3 %v234_v5  ;;  %v389_v22 = vld [vmem:[%s804_s0] sm:$0xf]  ;;  %v508_v23 = vld [vmem:[%s804_s0 + $0x4] sm:$0xf0]  ;;  %v399_v29 = vld [vmem:[%s804_s0 + $0x18] sm:$0xf0] }
   0x8   :  { %v421_v24 = vld [vmem:[%s804_s0 + $0x40] sm:$0xf]  ;;  %v516_v25 = vld [vmem:[%s804_s0 + $0x44] sm:$0xf0]  ;;  %v390_v26 = vor.u32 %v508_v23, %v389_v22  ;;  %v519_v30 = vld [vmem:[%s804_s0 + $0x64] sm:$0xf]  ;;  %v402_v32 = vor.u32 %v509_v28, %v399_v29 }
   0x9   :  { %v422_v27 = vor.u32 %v516_v25, %v421_v24  ;;  %v439_v31 = vld [vmem:[%s804_s0 + $0x68] sm:$0xf0]  ;;  %v397_v34 = vld [vmem:[%s804_s0 + $0x10] sm:$0xf]  ;;  %v510_v35 = vld [vmem:[%s804_s0 + $0x14] sm:$0xf0] }
   0xa   :  { %238 = vmatpush.bf16.msra.mxu0 %v528_v7  ;;  %537 = vmatpush.bf16.msra.mxu2 %v528_v7  ;;  %v442_v33 = vor.u32 %v519_v30, %v439_v31  ;;  %v429_v36 = vld [vmem:[%s804_s0 + $0x50] sm:$0xf]  ;;  %v518_v37 = vld [vmem:[%s804_s0 + $0x54] sm:$0xf0]  ;;  %v398_v38 = vor.u32 %v510_v35, %v397_v34  ;;  %v511_v40 = vld [vmem:[%s804_s0 + $0x24] sm:$0xf] }
   0xb   :  { %289 = vmatpush.bf16.msra.mxu1 %v534_v6  ;;  %544 = vmatpush.bf16.msra.mxu3 %v534_v6  ;;  %v430_v39 = vor.u32 %v518_v37, %v429_v36  ;;  %v407_v41 = vld [vmem:[%s804_s0 + $0x28] sm:$0xf0]  ;;  %v521_v42 = vld [vmem:[%s804_s0 + $0x74] sm:$0xf]  ;;  %v447_v43 = vld [vmem:[%s804_s0 + $0x78] sm:$0xf0] }
   0xc   :  { %v410_v44 = vor.u32 %v511_v40, %v407_v41  ;;  %v450_v45 = vor.u32 %v521_v42, %v447_v43  ;;  %v405_v46 = vld [vmem:[%s804_s0 + $0x20] sm:$0xf]  ;;  %v512_v47 = vld [vmem:[%s804_s0 + $0x24] sm:$0xf0]  ;;  %v513_v52 = vld [vmem:[%s804_s0 + $0x34] sm:$0xf] }
   0xd   :  { %v437_v48 = vld [vmem:[%s804_s0 + $0x60] sm:$0xf]  ;;  %v520_v49 = vld [vmem:[%s804_s0 + $0x64] sm:$0xf0]  ;;  %v406_v50 = vor.u32 %v512_v47, %v405_v46  ;;  %v415_v53 = vld [vmem:[%s804_s0 + $0x38] sm:$0xf0] }
   0xe   :  { %239 = vmatpush.bf16.msra.mxu0 %v527_v9  ;;  %538 = vmatpush.bf16.msra.mxu2 %v527_v9  ;;  %v438_v51 = vor.u32 %v520_v49, %v437_v48  ;;  %v418_v54 = vor.u32 %v513_v52, %v415_v53  ;;  %v413_v55 = vld [vmem:[%s804_s0 + $0x30] sm:$0xf]  ;;  %v514_v56 = vld [vmem:[%s804_s0 + $0x34] sm:$0xf0]  ;;  %v515_v61 = vld [vmem:[%s804_s0 + $0x44] sm:$0xf] }
   0xf   :  { %290 = vmatpush.bf16.msra.mxu1 %v533_v8  ;;  %545 = vmatpush.bf16.msra.mxu3 %v533_v8  ;;  %v445_v57 = vld [vmem:[%s804_s0 + $0x70] sm:$0xf]  ;;  %v522_v58 = vld [vmem:[%s804_s0 + $0x74] sm:$0xf0]  ;;  %v414_v59 = vor.u32 %v514_v56, %v413_v55  ;;  %v423_v62 = vld [vmem:[%s804_s0 + $0x48] sm:$0xf0] }
  0x10   :  { %v446_v60 = vor.u32 %v522_v58, %v445_v57  ;;  %v426_v63 = vor.u32 %v515_v61, %v423_v62  ;;  %v715_v1 = vld [vmem:[%s805_s2] ss:$0 sm:$0xff] }
  0x12   :  { %240 = vmatpush.bf16.msra.mxu0 %v526_v11  ;;  %539 = vmatpush.bf16.msra.mxu2 %v526_v11 }
  0x13   :  { %291 = vmatpush.bf16.msra.mxu1 %v532_v10  ;;  %546 = vmatpush.bf16.msra.mxu3 %v532_v10 }
  0x16   :  { %241 = vmatpush.bf16.msra.mxu0 %v525_v13  ;;  %540 = vmatpush.bf16.msra.mxu2 %v525_v13 }
  0x17   :  { %292 = vmatpush.bf16.msra.mxu1 %v531_v12  ;;  %547 = vmatpush.bf16.msra.mxu3 %v531_v12 }
  0x1a   :  { %499 = vmatmul.msk.bf16.vlgmr.msra.gmra.mxu1 %vm207_vm1, %v394_v18  ;;  %242 = vmatpush.bf16.msra.mxu0 %v524_v19 }
  0x1b   :  { %504 = vmatmul.msk.bf16.vlgmr.msra.gmra.mxu3 %vm207_vm1, %v434_v20  ;;  %541 = vmatpush.bf16.msra.mxu2 %v524_v19 }
  0x1e   :  { %243 = vmatpush.bf16.msra.mxu0 %v523_v21 }
  0x1f   :  { %542 = vmatpush.bf16.msra.mxu2 %v523_v21 }
  0x21   :  { %244 = vmatmul.bf16.vlgmr.msra.gmra.mxu0 %v390_v26 }
  0x22   :  { %264 = vmatmul.bf16.vlgmr.msra.gmra.mxu2 %v422_v27 }
  0x2a   :  { %500 = vmatmul.msk.bf16.gmra.mxu1 %vm207_vm1, %v402_v32 }
  0x2b   :  { %505 = vmatmul.msk.bf16.gmra.mxu3 %vm207_vm1, %v442_v33 }
  0x31   :  { %249 = vmatmul.bf16.gmra.mxu0 %v398_v38 }
  0x32   :  { %269 = vmatmul.bf16.gmra.mxu2 %v430_v39 }
  0x3a   :  { %501 = vmatmul.msk.bf16.gmra.mxu1 %vm207_vm1, %v410_v44 }
  0x3b   :  { %506 = vmatmul.msk.bf16.gmra.mxu3 %vm207_vm1, %v450_v45 }
  0x41   :  { %254 = vmatmul.bf16.gmra.mxu0 %v406_v50 }
  0x42   :  { %274 = vmatmul.bf16.gmra.mxu2 %v438_v51 }
  0x4a   :  { %502 = vmatmul.msk.bf16.gmra.mxu1 %vm207_vm1, %v418_v54 }
  0x51   :  { %259 = vmatmul.bf16.gmra.mxu0 %v414_v59 }
  0x52   :  { %279 = vmatmul.bf16.gmra.mxu2 %v446_v60 }
  0x5a   :  { %503 = vmatmul.msk.bf16.gmra.mxu1 %vm207_vm1, %v426_v63 }
  0x97   :  { %v294_v0 = vpop.f32.mrf.mxu1 }
  0x9e   :  { %v245_v3 = vpop.f32.mrf.mxu0  ;;  %v319_v16 = vpop.f32.mrf.mxu3 }
  0x9f   :  { %v296_v2 = vpop.f32.mrf.mxu1  ;;  %v246_v4 = vadd.f32 %v715_v1, %v245_v3 }
  0xa1   :  { %v295_v5 = vadd.f32 %v294_v0, %v246_v4 }
  0xa3   :  { %v334_v6 = vmax.f32 %v295_v5, 0.0 }
  0xa5   :  { %v350_v7 = vpack.c.bf16 %v334_v6, %v334_v6  ;;  %v718_v8 = vpop.f32.mrf.mxu2 }
  0xa6   :  { %v247_v10 = vpop.f32.mrf.mxu0  ;;  %v321_v28 = vpop.f32.mrf.mxu3  ;;  %v266_v6 = vadd.f32 %v715_v1, %v718_v8 }
  0xa7   :  { %v299_v9 = vpop.f32.mrf.mxu1  ;;  %367 = vst.msk [vmem:[%s806_s3] sm:$0xf] %vm366_vm2, %v350_v7  ;;  %v248_v11 = vadd.f32 %v715_v1, %v247_v10 }
  0xa9   :  { %v297_v12 = vadd.f32 %v296_v2, %v248_v11 }
  0xab   :  { %v335_v13 = vmax.f32 %v297_v12, 0.0 }
  0xad   :  { %v351_v14 = vpack.c.bf16 %v335_v13, %v335_v13  ;;  %v725_v15 = vpop.f32.mrf.mxu2 }
  0xae   :  { %v250_v18 = vpop.f32.mrf.mxu0  ;;  %v324_v42 = vpop.f32.mrf.mxu3 }
  0xaf   :  { %v301_v17 = vpop.f32.mrf.mxu1  ;;  %368 = vst.msk [vmem:[%s806_s3 + $0x4] sm:$0xf] %vm366_vm2, %v351_v14  ;;  %v251_v19 = vadd.f32 %v715_v1, %v250_v18 }
  0xb1   :  { %v300_v20 = vadd.f32 %v299_v9, %v251_v19 }
  0xb3   :  { %v336_v21 = vmax.f32 %v300_v20, 0.0 }
  0xb5   :  { %v352_v22 = vpack.c.bf16 %v336_v21, %v336_v21  ;;  %v270_v23 = vpop.f32.mrf.mxu2 }
  0xb6   :  { %v271_v24 = vadd.f32 %v715_v1, %v270_v23  ;;  %v252_v26 = vpop.f32.mrf.mxu0  ;;  %v326_v56 = vpop.f32.mrf.mxu3  ;;  %v268_v23 = vadd.f32 %v715_v1, %v725_v15 }
  0xb7   :  { %v304_v25 = vpop.f32.mrf.mxu1  ;;  %369 = vst.msk [vmem:[%s806_s3 + $0x8] sm:$0xf] %vm366_vm2, %v352_v22  ;;  %v253_v27 = vadd.f32 %v715_v1, %v252_v26 }
  0xb8   :  { %v320_v29 = vadd.f32 %v319_v16, %v271_v24 }
  0xb9   :  { %v302_v30 = vadd.f32 %v301_v17, %v253_v27 }
  0xba   :  { %v344_v31 = vmax.f32 %v320_v29, 0.0 }
  0xbb   :  { %v337_v32 = vmax.f32 %v302_v30, 0.0 }
  0xbc   :  { %v360_v33 = vpack.c.bf16 %v344_v31, %v344_v31 }
  0xbd   :  { %v353_v34 = vpack.c.bf16 %v337_v32, %v337_v32  ;;  %v272_v35 = vpop.f32.mrf.mxu2 }
  0xbe   :  { %377 = vst.msk [vmem:[%s806_s3 + $0x28] sm:$0xf] %vm366_vm2, %v360_v33  ;;  %v273_v36 = vadd.f32 %v715_v1, %v272_v35  ;;  %v255_v38 = vpop.f32.mrf.mxu0  ;;  %v329_v9 = vpop.f32.mrf.mxu3 }
  0xbf   :  { %v306_v37 = vpop.f32.mrf.mxu1  ;;  %370 = vst.msk [vmem:[%s806_s3 + $0xc] sm:$0xf] %vm366_vm2, %v353_v34  ;;  %v256_v39 = vadd.f32 %v715_v1, %v255_v38 }
  0xc0   :  { %v322_v40 = vadd.f32 %v321_v28, %v273_v36 }
  0xc1   :  { %v305_v41 = vadd.f32 %v304_v25, %v256_v39 }
  0xc2   :  { %v345_v43 = vmax.f32 %v322_v40, 0.0 }
  0xc3   :  { %v338_v44 = vmax.f32 %v305_v41, 0.0 }
  0xc4   :  { %v361_v45 = vpack.c.bf16 %v345_v43, %v345_v43 }
  0xc5   :  { %v354_v46 = vpack.c.bf16 %v338_v44, %v338_v44  ;;  %v275_v47 = vpop.f32.mrf.mxu2 }
  0xc6   :  { %378 = vst.msk [vmem:[%s806_s3 + $0x2c] sm:$0xf] %vm366_vm2, %v361_v45  ;;  %v276_v48 = vadd.f32 %v715_v1, %v275_v47  ;;  %v257_v50 = vpop.f32.mrf.mxu0  ;;  %v331_v15 = vpop.f32.mrf.mxu3 }
  0xc7   :  { %v309_v49 = vpop.f32.mrf.mxu1  ;;  %371 = vst.msk [vmem:[%s806_s3 + $0x10] sm:$0xf] %vm366_vm2, %v354_v46  ;;  %v258_v51 = vadd.f32 %v715_v1, %v257_v50 }
  0xc8   :  { %v325_v52 = vadd.f32 %v324_v42, %v276_v48 }
  0xc9   :  { %v307_v53 = vadd.f32 %v306_v37, %v258_v51 }
  0xca   :  { %v346_v54 = vmax.f32 %v325_v52, 0.0 }
  0xcb   :  { %v339_v55 = vmax.f32 %v307_v53, 0.0 }
  0xcc   :  { %v362_v57 = vpack.c.bf16 %v346_v54, %v346_v54 }
  0xcd   :  { %v355_v58 = vpack.c.bf16 %v339_v55, %v339_v55  ;;  %v277_v59 = vpop.f32.mrf.mxu2 }
  0xce   :  { %379 = vst.msk [vmem:[%s806_s3 + $0x30] sm:$0xf] %vm366_vm2, %v362_v57  ;;  %v278_v60 = vadd.f32 %v715_v1, %v277_v59  ;;  %v260_v62 = vpop.f32.mrf.mxu0 }
  0xcf   :  { %v311_v61 = vpop.f32.mrf.mxu1  ;;  %372 = vst.msk [vmem:[%s806_s3 + $0x14] sm:$0xf] %vm366_vm2, %v355_v58  ;;  %v261_v63 = vadd.f32 %v715_v1, %v260_v62 }
  0xd0   :  { %v327_v0 = vadd.f32 %v326_v56, %v278_v60 }
  0xd1   :  { %v310_v2 = vadd.f32 %v309_v49, %v261_v63 }
  0xd2   :  { %v347_v3 = vmax.f32 %v327_v0, 0.0 }
  0xd3   :  { %v340_v4 = vmax.f32 %v310_v2, 0.0 }
  0xd4   :  { %v363_v5 = vpack.c.bf16 %v347_v3, %v347_v3 }
  0xd5   :  { %v356_v7 = vpack.c.bf16 %v340_v4, %v340_v4  ;;  %v280_v10 = vpop.f32.mrf.mxu2 }
  0xd6   :  { %380 = vst.msk [vmem:[%s806_s3 + $0x34] sm:$0xf] %vm366_vm2, %v363_v5  ;;  %v281_v11 = vadd.f32 %v715_v1, %v280_v10  ;;  %v262_v13 = vpop.f32.mrf.mxu0 }
  0xd7   :  { %v314_v12 = vpop.f32.mrf.mxu1  ;;  %373 = vst.msk [vmem:[%s806_s3 + $0x18] sm:$0xf] %vm366_vm2, %v356_v7  ;;  %v263_v8 = vadd.f32 %v715_v1, %v262_v13 }
  0xd8   :  { %v315_v14 = vadd.f32 %v314_v12, %v266_v6  ;;  %v330_v16 = vadd.f32 %v329_v9, %v281_v11 }
  0xd9   :  { %v312_v18 = vadd.f32 %v311_v61, %v263_v8 }
  0xda   :  { %v342_v17 = vmax.f32 %v315_v14, 0.0  ;;  %v348_v19 = vmax.f32 %v330_v16, 0.0 }
  0xdb   :  { %v341_v21 = vmax.f32 %v312_v18, 0.0 }
  0xdc   :  { %v358_v20 = vpack.c.bf16 %v342_v17, %v342_v17  ;;  %v364_v22 = vpack.c.bf16 %v348_v19, %v348_v19 }
  0xdd   :  { %v357_v24 = vpack.c.bf16 %v341_v21, %v341_v21  ;;  %v282_v25 = vpop.f32.mrf.mxu2 }
  0xde   :  { %375 = vst.msk [vmem:[%s806_s3 + $0x20] sm:$0xf] %vm366_vm2, %v358_v20  ;;  %v283_v26 = vadd.f32 %v715_v1, %v282_v25 }
  0xdf   :  { %381 = vst.msk [vmem:[%s806_s3 + $0x38] sm:$0xf] %vm366_vm2, %v364_v22  ;;  %v316_v27 = vpop.f32.mrf.mxu1 }
  0xe0   :  { %374 = vst.msk [vmem:[%s806_s3 + $0x1c] sm:$0xf] %vm366_vm2, %v357_v24  ;;  %v317_v28 = vadd.f32 %v316_v27, %v268_v23  ;;  %v332_v29 = vadd.f32 %v331_v15, %v283_v26 }
  0xe2   :  { %v343_v30 = vmax.f32 %v317_v28, 0.0  ;;  %v349_v31 = vmax.f32 %v332_v29, 0.0 }
  0xe4   :  { %v359_v32 = vpack.c.bf16 %v343_v30, %v343_v30  ;;  %v365_v33 = vpack.c.bf16 %v349_v31, %v349_v31 }
  0xe6   :  { %376 = vst.msk [vmem:[%s806_s3 + $0x24] sm:$0xf] %vm366_vm2, %v359_v32 }
  0xe7   :  { %382 = vst.msk [vmem:[%s806_s3 + $0x3c] sm:$0xf] %vm366_vm2, %v365_v33 }

</bundles_post_ra>
